<compile_context>
chip_gen: v7x
topology: tpu7x:2x2x1
jax: 0.10.0
libtpu: 0.0.40
codegen_flags: <defaults>
</compile_context>

<pallas_src>
import functools

import jax
import jax.numpy as jnp
from jax import lax
from jax.experimental import pallas as pl
from jax.experimental.pallas import tpu as pltpu

_NEG_INF = -1.0e30   # finite "minus infinity" -> exp() underflows to exactly 0
_LANES = 128


def _astp_kernel(x_ref, w1_ref, b1_ref, w2_ref, b2_ref, out_ref,
                 m_sc, l_sc, s1_sc, s2_sc, *, seq_len, tile_t, needs_mask):
    """One (batch b, time-tile t) step of attentive statistics pooling."""
    t = pl.program_id(1)
    n_t = pl.num_programs(1)
    n_g = tile_t // _LANES

    @pl.when(t == 0)
    def _init():
        m_sc[...] = jnp.full_like(m_sc, _NEG_INF)
        l_sc[...] = jnp.zeros_like(l_sc)
        s1_sc[...] = jnp.zeros_like(s1_sc)
        s2_sc[...] = jnp.zeros_like(s2_sc)

    x = x_ref[0]                                   # (F, tT) float32
    w1 = w1_ref[...]                               # (BD, F) compute dtype
    w2 = w2_ref[...]                               # (F, BD) compute dtype
    b1 = b1_ref[0]                                 # (BD, 128) f32 (lane-dense)
    b2 = b2_ref[...]                               # (F, 128)  f32 (lane-dense)

    # linear1 (1x1 conv) over the whole tile on the MXU, f32 accumulation.
    h = jnp.dot(w1, x.astype(w1.dtype), preferred_element_type=jnp.float32)

    def _accumulate(apply_mask):
        # Phase 1: per-128-lane-group tanh + linear2 logits and the per-lane
        # tile max.  All bias adds are dense (., 128) + (., 128) VPU adds;
        # group slices are lane-tile aligned (no relayout).
        logits = []
        m_tile = None
        for g in range(n_g):
            lo = g * _LANES
            a_g = jnp.tanh(h[:, lo:lo + _LANES] + b1)              # (BD, 128)
            lg = jnp.dot(w2, a_g.astype(w2.dtype),
                         preferred_element_type=jnp.float32) + b2  # (F, 128)
            if apply_mask:
                t_idx = (t * tile_t + lo
                         + lax.broadcasted_iota(jnp.int32, (1, _LANES), 1))
                lg = jnp.where(t_idx < seq_len, lg, _NEG_INF)
            logits.append(lg)
            m_tile = lg if m_tile is None else jnp.maximum(m_tile, lg)

        # Phase 2: single per-lane rescale of the running sums, then dense
        # per-group accumulation.  Pure VPU/EUP — no cross-lane work here.
        m_prev = m_sc[...]
        m_new = jnp.maximum(m_prev, m_tile)
        corr = jnp.exp(m_prev - m_new)
        l_acc = corr * l_sc[...]
        s1_acc = corr * s1_sc[...]
        s2_acc = corr * s2_sc[...]
        for g in range(n_g):
            lo = g * _LANES
            x_g = x[:, lo:lo + _LANES]
            p_g = jnp.exp(logits[g] - m_new)       # exactly 0 on padded steps
            px = p_g * x_g
            l_acc = l_acc + p_g
            s1_acc = s1_acc + px
            s2_acc = s2_acc + px * x_g
        m_sc[...] = m_new
        l_sc[...] = l_acc
        s1_sc[...] = s1_acc
        s2_sc[...] = s2_acc

    if needs_mask:
        # Only the final time tile contains padding: keep the compare/select
        # off the hot (non-final) tiles.
        @pl.when(t < n_t - 1)
        def _hot():
            _accumulate(apply_mask=False)

        @pl.when(t == n_t - 1)
        def _last():
            _accumulate(apply_mask=True)
    else:
        _accumulate(apply_mask=False)

    @pl.when(t == n_t - 1)
    def _finalize():
        # Merge the 128 per-lane partials into per-row statistics.  These are
        # the only cross-lane reductions, once per batch.  Fully padded lanes
        # carry m == -1e30, so their merge weight exp(m - row_max) == 0 and
        # any garbage they accumulated contributes nothing.
        m = m_sc[...]
        row_max = jnp.max(m, axis=-1, keepdims=True)            # (F, 1)
        w = jnp.exp(m - row_max)                                 # (F, 128)
        l = jnp.sum(w * l_sc[...], axis=-1, keepdims=True)
        s1 = jnp.sum(w * s1_sc[...], axis=-1, keepdims=True)
        s2 = jnp.sum(w * s2_sc[...], axis=-1, keepdims=True)
        inv_l = pl.reciprocal(l, approx=False)     # exact: runs once per batch
        mean = s1 * inv_l
        msq = s2 * inv_l
        var = msq - mean * mean
        std = jnp.sqrt(jnp.maximum(var, 1e-10))
        out_ref[0] = jnp.concatenate([mean, std], axis=0)        # (2F, 1)


def _round_up(v, m):
    return (v + m - 1) // m * m


def _vmem_capacity_bytes():
    """Physical VMEM per core (64 MiB v7x, 128 MiB v5e/v6e); safe fallback."""
    try:
        info = pltpu.get_tpu_info()
        cap = getattr(info, "vmem_capacity_bytes", None)
        if cap:
            return int(cap)
    except Exception:
        pass
    return 128 * 1024 * 1024


def _vmem_estimate(f, bd, t_t, w_bytes):
    """Generous per-step footprint: double-buffered blocks, lane-padded
    scratch, and compiler-managed f32/bf16 intermediates."""
    x_blocks = 2 * f * t_t * 4                       # (F, tT) f32, double-buffered
    weights = 2 * 2 * bd * f * w_bytes               # w1 + w2 (count 2x for safety)
    biases = 2 * (bd + f) * _LANES * 4               # (BD,128) + (F,128)
    scratch = 4 * f * _LANES * 4                     # m/l/s1/s2 (lane-padded)
    out_blk = 2 * 2 * f * _LANES * 4                 # (2F,1) block lane-pads to 128
    interm = ((bd + f) * t_t * 4                     # h + per-group logits (f32)
              + (bd + f) * t_t * w_bytes             # bf16/f32 casts for the MXU
              + 8 * f * _LANES * 4)                  # misc (F,128) temporaries
    return x_blocks + weights + biases + scratch + out_blk + interm


def _choose_time_block(t, f, bd, w_bytes, vmem_budget):
    """Largest lane-dense time tile (multiple of 128) whose estimated VMEM
    footprint fits the per-generation budget, capped at ~8 MiB of x per tile
    and at the (128-rounded) sequence length."""
    t_cap = _round_up(max(t, 1), _LANES)
    bytes_cap = max(_LANES,
                    ((8 * 1024 * 1024) // (4 * max(f, 1))) // _LANES * _LANES)
    hi = min(2048, t_cap, bytes_cap)
    best = _LANES
    t_t = _LANES
    while t_t <= hi:
        if _vmem_estimate(f, bd, t_t, w_bytes) <= vmem_budget:
            best = t_t
        t_t += _LANES
    return best


def astp_forward(x, w1, b1, w2, b2, *, global_context_att=False,
                 compute_dtype=jnp.bfloat16, time_block=None):
    """x: (B, F, T) or (B, C, Fr, T). Returns (B, 2*F) = cat([mean, std], 1).

    Note: compute_dtype=bfloat16 (default) runs the two 1x1-conv matmuls in
    bf16 with f32 accumulation (~1e-2 deviation from the f32 reference); all
    transcendentals and statistics stay in f32.  Pass compute_dtype=float32
    for reference-accurate results.
    """
    if x.ndim == 4:
        x = x.reshape(x.shape[0], x.shape[1] * x.shape[2], x.shape[3])
    assert x.ndim == 3
    x = x.astype(jnp.float32)
    B, F, T = x.shape
    BD = w1.shape[0]

    w1 = w1.astype(jnp.float32)
    b1 = b1.astype(jnp.float32)
    w2 = w2.astype(jnp.float32)
    b2 = b2.astype(jnp.float32)

    # Global-context path: do NOT build the (3F, T) concat.  Split w1 and fold
    # the rank-1 context-mean / context-std contributions into a per-batch
    # bias (cm/cs are cheap per-batch reductions; unbiased var needs T >= 2,
    # same as the torch module).
    # TODO(synk): cm/cs is one extra pass over x in HBM; relying on XLA to
    #   fuse the mean/var reductions into a single pass.
    if global_context_att:
        assert w1.shape[1] == 3 * F
        w1_x, w1_cm, w1_cs = w1[:, :F], w1[:, F:2 * F], w1[:, 2 * F:]
        cm = jnp.mean(x, axis=-1, keepdims=True)                    # (B, F, 1)
        cv = jnp.var(x, axis=-1, keepdims=True, ddof=1)             # unbiased
        cs = jnp.sqrt(cv + 1e-10)
        b1_eff = (b1[None, :, None]
                  + jnp.einsum('of,bfi->boi', w1_cm, cm)
                  + jnp.einsum('of,bfi->boi', w1_cs, cs))           # (B, BD, 1)
    else:
        assert w1.shape[1] == F
        w1_x = w1
        b1_eff = jnp.broadcast_to(b1[None, :, None], (B, BD, 1))

    # Lane-dense biases: (B, BD, 128) and (F, 128), so in-kernel bias adds are
    # dense per-lane-group VPU adds (no column->lane splat).
    b1_l = jnp.broadcast_to(b1_eff.astype(jnp.float32), (B, BD, _LANES))
    b2_l = jnp.broadcast_to(b2.reshape(F, 1), (F, _LANES))

    w_bytes = jnp.dtype(compute_dtype).itemsize

    # Generation-aware VMEM budget: ~3/4 of physical VMEM (48 MiB on v7x,
    # ~96 MiB on v5e/v6e), with extra headroom when sizing the tile.
    vmem_cap = _vmem_capacity_bytes()
    gen_cap = min(3 * vmem_cap // 4, 100 * 1024 * 1024)
    vmem_limit = int(max(32 * 1024 * 1024, gen_cap))

    if time_block is None:
        tT = _choose_time_block(T, F, BD, w_bytes, int(0.85 * gen_cap))
    else:
        tT = int(time_block)
        assert tT % _LANES == 0

    # Pad T up to a multiple of the CHOSEN tile (padding < tT, so only the
    # last tile is ever padded; fully padded lanes are handled in-kernel).
    T_pad = _round_up(max(T, 1), tT)
    x_p = jnp.pad(x, ((0, 0), (0, 0), (0, T_pad - T))) if T_pad != T else x
    n_t = T_pad // tT

    w1_c = w1_x.astype(compute_dtype)
    w2_c = w2.astype(compute_dtype)

    kernel = functools.partial(_astp_kernel, seq_len=T, tile_t=tT,
                               needs_mask=(T_pad != T))

    out = pl.pallas_call(
        kernel,
        out_shape=jax.ShapeDtypeStruct((B, 2 * F, 1), jnp.float32),
        grid_spec=pltpu.PrefetchScalarGridSpec(
            num_scalar_prefetch=0,
            grid=(B, n_t),
            in_specs=[
                pl.BlockSpec((1, F, tT), lambda b, t: (b, 0, t)),     # x tile
                pl.BlockSpec((BD, F), lambda b, t: (0, 0)),           # w1 (x part)
                pl.BlockSpec((1, BD, _LANES), lambda b, t: (b, 0, 0)),  # b1_eff[b]
                pl.BlockSpec((F, BD), lambda b, t: (0, 0)),           # w2
                pl.BlockSpec((F, _LANES), lambda b, t: (0, 0)),       # b2
            ],
            out_specs=pl.BlockSpec((1, 2 * F, 1), lambda b, t: (b, 0, 0)),
            scratch_shapes=[pltpu.VMEM((F, _LANES), jnp.float32)] * 4,
        ),
        compiler_params=pltpu.CompilerParams(
            dimension_semantics=("parallel", "arbitrary"),
            vmem_limit_bytes=vmem_limit),
    )(x_p, w1_c, b1_l, w2_c, b2_l)

    return out[:, :, 0]                      # (B, 2F)


def astp_reference(x, w1, b1, w2, b2, *, global_context_att=False):
    """Pure-JAX reference mirroring the PyTorch ASTP forward."""
    if x.ndim == 4:
        x = x.reshape(x.shape[0], x.shape[1] * x.shape[2], x.shape[3])
    x = x.astype(jnp.float32)
    if global_context_att:
        cm = jnp.mean(x, axis=-1, keepdims=True)
        cv = jnp.var(x, axis=-1, keepdims=True, ddof=1)
        cs = jnp.sqrt(cv + 1e-10)
        x_in = jnp.concatenate([x,
                                jnp.broadcast_to(cm, x.shape),
                                jnp.broadcast_to(cs, x.shape)], axis=1)
    else:
        x_in = x
    a = jnp.tanh(jnp.einsum('of,bft->bot', w1, x_in) + b1[None, :, None])
    logits = jnp.einsum('fo,bot->bft', w2, a) + b2[None, :, None]
    alpha = jax.nn.softmax(logits, axis=2)
    mean = jnp.sum(alpha * x, axis=2)
    var = jnp.sum(alpha * x ** 2, axis=2) - mean ** 2
    std = jnp.sqrt(jnp.clip(var, 1e-10))
    return jnp.concatenate([mean, std], axis=1)


if __name__ == "__main__":
    key = jax.random.PRNGKey(0)
    kx, k1, k2, k3, k4, kx2, kx3 = jax.random.split(key, 7)

    # --- Test 1: 4D resnet-style input, module default (no global context) ---
    B, C, Fr, T = 2, 4, 8, 16
    in_dim = C * Fr                       # 32
    BD = 16
    x4 = jax.random.normal(kx, (B, C, Fr, T), dtype=jnp.float32)
    w1 = 0.1 * jax.random.normal(k1, (BD, in_dim), dtype=jnp.float32)
    b1 = 0.1 * jax.random.normal(k2, (BD,), dtype=jnp.float32)
    w2 = 0.1 * jax.random.normal(k3, (in_dim, BD), dtype=jnp.float32)
    b2 = 0.1 * jax.random.normal(k4, (in_dim,), dtype=jnp.float32)

    ref1 = astp_reference(x4, w1, b1, w2, b2)

    out_f32 = jax.block_until_ready(
        astp_forward(x4, w1, b1, w2, b2, compute_dtype=jnp.float32))
    assert out_f32.shape == (B, 2 * in_dim)
    assert jnp.allclose(out_f32, ref1, atol=2e-5, rtol=2e-5), (
        f"f32 max err {jnp.max(jnp.abs(out_f32 - ref1))}")

    out_bf16 = jax.block_until_ready(
        astp_forward(x4, w1, b1, w2, b2, compute_dtype=jnp.bfloat16))
    assert out_bf16.shape == (B, 2 * in_dim)
    assert jnp.allclose(out_bf16, ref1, atol=2e-2, rtol=2e-2), (
        f"bf16 max err {jnp.max(jnp.abs(out_bf16 - ref1))}")

    # --- Test 2: multi-tile online softmax (T=200, two 128-lane tiles) ---
    T2 = 200
    x3 = jax.random.normal(kx2, (B, in_dim, T2), dtype=jnp.float32)
    ref2 = astp_reference(x3, w1, b1, w2, b2)
    out2 = jax.block_until_ready(
        astp_forward(x3, w1, b1, w2, b2, compute_dtype=jnp.float32,
                     time_block=128))
    assert jnp.allclose(out2, ref2, atol=2e-5, rtol=2e-5), (
        f"online-softmax max err {jnp.max(jnp.abs(out2 - ref2))}")

    # --- Test 3: global_context_att=True (weight-split / bias-fold path) ---
    kg1, _ = jax.random.split(k1)
    w1g = 0.1 * jax.random.normal(kg1, (BD, 3 * in_dim), dtype=jnp.float32)
    ref3 = astp_reference(x4, w1g, b1, w2, b2, global_context_att=True)
    out3 = jax.block_until_ready(
        astp_forward(x4, w1g, b1, w2, b2, global_context_att=True,
                     compute_dtype=jnp.float32))
    assert jnp.allclose(out3, ref3, atol=2e-5, rtol=2e-5), (
        f"global-context max err {jnp.max(jnp.abs(out3 - ref3))}")

    # --- Test 4: tile larger than T (fully padded lanes / lane group) ---
    T4 = 100
    x5 = jax.random.normal(kx3, (B, in_dim, T4), dtype=jnp.float32)
    ref4 = astp_reference(x5, w1, b1, w2, b2)
    out4 = jax.block_until_ready(
        astp_forward(x5, w1, b1, w2, b2, compute_dtype=jnp.float32,
                     time_block=256))
    assert jnp.allclose(out4, ref4, atol=2e-5, rtol=2e-5), (
        f"fully-padded-lane max err {jnp.max(jnp.abs(out4 - ref4))}")

    # --- Test 5: default tile chooser with non-multiple-of-128 T ---
    T5 = 300
    x6 = jax.random.normal(kx2, (B, in_dim, T5), dtype=jnp.float32)
    ref5 = astp_reference(x6, w1, b1, w2, b2)
    out5 = jax.block_until_ready(
        astp_forward(x6, w1, b1, w2, b2, compute_dtype=jnp.float32))
    assert jnp.allclose(out5, ref5, atol=2e-5, rtol=2e-5), (
        f"default-tile max err {jnp.max(jnp.abs(out5 - ref5))}")

    print("KERNEL_OK")
</pallas_src>

<mosaic_0001>
module attributes {stable_mosaic.version = 11 : i64} {
  func.func @_astp_kernel(%arg0: i32, %arg1: i32, %arg2: memref<1x32x128xf32, #tpu.memory_space<vmem>>, %arg3: memref<16x32xf32, #tpu.memory_space<vmem>>, %arg4: memref<1x16x128xf32, #tpu.memory_space<vmem>>, %arg5: memref<32x16xf32, #tpu.memory_space<vmem>>, %arg6: memref<32x128xf32, #tpu.memory_space<vmem>>, %arg7: memref<1x64x1xf32, #tpu.memory_space<vmem>>, %arg8: memref<32x128xf32, #tpu.memory_space<vmem>>, %arg9: memref<32x128xf32, #tpu.memory_space<vmem>>, %arg10: memref<32x128xf32, #tpu.memory_space<vmem>>, %arg11: memref<32x128xf32, #tpu.memory_space<vmem>>) attributes {dimension_semantics = [#tpu.dimension_semantics<parallel>, #tpu.dimension_semantics<arbitrary>], iteration_bounds = array<i64: 2, 1>, scalar_prefetch = 0 : i64, scratch_operands = 4 : i64, tpu.core_type = #tpu.core_type<tc>, window_params = [{transform_indices = @transform_0, window_bounds = array<i64: 1, 32, 128>}, {pipeline_mode = #tpu.pipeline_mode<synchronous>, transform_indices = @transform_1, window_bounds = array<i64: 16, 32>}, {transform_indices = @transform_2, window_bounds = array<i64: 1, 16, 128>}, {pipeline_mode = #tpu.pipeline_mode<synchronous>, transform_indices = @transform_3, window_bounds = array<i64: 32, 16>}, {pipeline_mode = #tpu.pipeline_mode<synchronous>, transform_indices = @transform_4, window_bounds = array<i64: 32, 128>}, {transform_indices = @transform_5, window_bounds = array<i64: 1, 64, 1>}]} {
    %c0_i32 = arith.constant 0 : i32
    %0 = arith.cmpi eq, %arg1, %c0_i32 : i32
    %1 = arith.extui %0 : i1 to i32
    %c0_i32_0 = arith.constant 0 : i32
    %2 = arith.cmpi ne, %1, %c0_i32_0 : i32
    scf.if %2 {
      %cst_18 = arith.constant -1.000000e+30 : f32
      %20 = vector.broadcast %cst_18 : f32 to vector<32x128xf32>
      %c0_19 = arith.constant 0 : index
      %c0_20 = arith.constant 0 : index
      %21 = vector.load %arg8[%c0_19, %c0_20] : memref<32x128xf32, #tpu.memory_space<vmem>>, vector<32x128xf32>
      tpu.vector_store %arg8[%c0_19, %c0_20], %20 {strides = array<i32>} : memref<32x128xf32, #tpu.memory_space<vmem>>, vector<32x128xf32>,
      %cst_21 = arith.constant 0.000000e+00 : f32
      %22 = vector.broadcast %cst_21 : f32 to vector<32x128xf32>
      %c0_22 = arith.constant 0 : index
      %c0_23 = arith.constant 0 : index
      %23 = vector.load %arg9[%c0_22, %c0_23] : memref<32x128xf32, #tpu.memory_space<vmem>>, vector<32x128xf32>
      tpu.vector_store %arg9[%c0_22, %c0_23], %22 {strides = array<i32>} : memref<32x128xf32, #tpu.memory_space<vmem>>, vector<32x128xf32>,
      %cst_24 = arith.constant 0.000000e+00 : f32
      %24 = vector.broadcast %cst_24 : f32 to vector<32x128xf32>
      %c0_25 = arith.constant 0 : index
      %c0_26 = arith.constant 0 : index
      %25 = vector.load %arg10[%c0_25, %c0_26] : memref<32x128xf32, #tpu.memory_space<vmem>>, vector<32x128xf32>
      tpu.vector_store %arg10[%c0_25, %c0_26], %24 {strides = array<i32>} : memref<32x128xf32, #tpu.memory_space<vmem>>, vector<32x128xf32>,
      %cst_27 = arith.constant 0.000000e+00 : f32
      %26 = vector.broadcast %cst_27 : f32 to vector<32x128xf32>
      %c0_28 = arith.constant 0 : index
      %c0_29 = arith.constant 0 : index
      %27 = vector.load %arg11[%c0_28, %c0_29] : memref<32x128xf32, #tpu.memory_space<vmem>>, vector<32x128xf32>
      tpu.vector_store %arg11[%c0_28, %c0_29], %26 {strides = array<i32>} : memref<32x128xf32, #tpu.memory_space<vmem>>, vector<32x128xf32>,
    } else {
    }
    %c0 = arith.constant 0 : index
    %c0_1 = arith.constant 0 : index
    %c0_2 = arith.constant 0 : index
    %3 = vector.load %arg2[%c0, %c0_1, %c0_2] : memref<1x32x128xf32, #tpu.memory_space<vmem>>, vector<1x32x128xf32>
    %4 = vector.shape_cast %3 : vector<1x32x128xf32> to vector<32x128xf32>
    %c0_3 = arith.constant 0 : index
    %c0_4 = arith.constant 0 : index
    %5 = vector.load %arg3[%c0_3, %c0_4] : memref<16x32xf32, #tpu.memory_space<vmem>>, vector<16x32xf32>
    %c0_5 = arith.constant 0 : index
    %c0_6 = arith.constant 0 : index
    %6 = vector.load %arg5[%c0_5, %c0_6] : memref<32x16xf32, #tpu.memory_space<vmem>>, vector<32x16xf32>
    %c0_7 = arith.constant 0 : index
    %c0_8 = arith.constant 0 : index
    %c0_9 = arith.constant 0 : index
    %7 = vector.load %arg4[%c0_7, %c0_8, %c0_9] : memref<1x16x128xf32, #tpu.memory_space<vmem>>, vector<1x16x128xf32>
    %8 = vector.shape_cast %7 : vector<1x16x128xf32> to vector<16x128xf32>
    %c0_10 = arith.constant 0 : index
    %c0_11 = arith.constant 0 : index
    %9 = vector.load %arg6[%c0_10, %c0_11] : memref<32x128xf32, #tpu.memory_space<vmem>>, vector<32x128xf32>
    %cst = arith.constant dense<0.000000e+00> : vector<16x128xf32>
    %10 = tpu.matmul %5, %4, %cst {dimension_numbers = #tpu.dot_dimension_numbers<[1], [0], [0], [1], [0, 0, 1, 1], [], []>} : vector<16x32xf32>, vector<32x128xf32>, vector<16x128xf32> -> vector<16x128xf32>
    %c0_i32_12 = arith.constant 0 : i32
    %11 = arith.cmpi slt, %arg1, %c0_i32_12 : i32
    %12 = arith.extui %11 : i1 to i32
    %c0_i32_13 = arith.constant 0 : i32
    %13 = arith.cmpi ne, %12, %c0_i32_13 : i32
    scf.if %13 {
      %20 = arith.addf %10, %8 : vector<16x128xf32>
      %21 = math.tanh %20 : vector<16x128xf32>
      %cst_18 = arith.constant dense<0.000000e+00> : vector<32x128xf32>
      %22 = tpu.matmul %6, %21, %cst_18 {dimension_numbers = #tpu.dot_dimension_numbers<[1], [0], [0], [1], [0, 0, 1, 1], [], []>} : vector<32x16xf32>, vector<16x128xf32>, vector<32x128xf32> -> vector<32x128xf32>
      %23 = arith.addf %22, %9 : vector<32x128xf32>
      %c0_19 = arith.constant 0 : index
      %c0_20 = arith.constant 0 : index
      %24 = vector.load %arg8[%c0_19, %c0_20] : memref<32x128xf32, #tpu.memory_space<vmem>>, vector<32x128xf32>
      %25 = arith.maximumf %24, %23 : vector<32x128xf32>
      %26 = arith.subf %24, %25 : vector<32x128xf32>
      %27 = math.exp %26 : vector<32x128xf32>
      %c0_21 = arith.constant 0 : index
      %c0_22 = arith.constant 0 : index
      %28 = vector.load %arg9[%c0_21, %c0_22] : memref<32x128xf32, #tpu.memory_space<vmem>>, vector<32x128xf32>
      %29 = arith.mulf %27, %28 : vector<32x128xf32>
      %c0_23 = arith.constant 0 : index
      %c0_24 = arith.constant 0 : index
      %30 = vector.load %arg10[%c0_23, %c0_24] : memref<32x128xf32, #tpu.memory_space<vmem>>, vector<32x128xf32>
      %31 = arith.mulf %27, %30 : vector<32x128xf32>
      %c0_25 = arith.constant 0 : index
      %c0_26 = arith.constant 0 : index
      %32 = vector.load %arg11[%c0_25, %c0_26] : memref<32x128xf32, #tpu.memory_space<vmem>>, vector<32x128xf32>
      %33 = arith.mulf %27, %32 : vector<32x128xf32>
      %34 = arith.subf %23, %25 : vector<32x128xf32>
      %35 = math.exp %34 : vector<32x128xf32>
      %36 = arith.mulf %35, %4 : vector<32x128xf32>
      %37 = arith.addf %29, %35 : vector<32x128xf32>
      %38 = arith.addf %31, %36 : vector<32x128xf32>
      %39 = arith.mulf %36, %4 : vector<32x128xf32>
      %40 = arith.addf %33, %39 : vector<32x128xf32>
      %c0_27 = arith.constant 0 : index
      %c0_28 = arith.constant 0 : index
      %41 = vector.load %arg8[%c0_27, %c0_28] : memref<32x128xf32, #tpu.memory_space<vmem>>, vector<32x128xf32>
      tpu.vector_store %arg8[%c0_27, %c0_28], %25 {strides = array<i32>} : memref<32x128xf32, #tpu.memory_space<vmem>>, vector<32x128xf32>,
      %c0_29 = arith.constant 0 : index
      %c0_30 = arith.constant 0 : index
      %42 = vector.load %arg9[%c0_29, %c0_30] : memref<32x128xf32, #tpu.memory_space<vmem>>, vector<32x128xf32>
      tpu.vector_store %arg9[%c0_29, %c0_30], %37 {strides = array<i32>} : memref<32x128xf32, #tpu.memory_space<vmem>>, vector<32x128xf32>,
      %c0_31 = arith.constant 0 : index
      %c0_32 = arith.constant 0 : index
      %43 = vector.load %arg10[%c0_31, %c0_32] : memref<32x128xf32, #tpu.memory_space<vmem>>, vector<32x128xf32>
      tpu.vector_store %arg10[%c0_31, %c0_32], %38 {strides = array<i32>} : memref<32x128xf32, #tpu.memory_space<vmem>>, vector<32x128xf32>,
      %c0_33 = arith.constant 0 : index
      %c0_34 = arith.constant 0 : index
      %44 = vector.load %arg11[%c0_33, %c0_34] : memref<32x128xf32, #tpu.memory_space<vmem>>, vector<32x128xf32>
      tpu.vector_store %arg11[%c0_33, %c0_34], %40 {strides = array<i32>} : memref<32x128xf32, #tpu.memory_space<vmem>>, vector<32x128xf32>,
    } else {
    }
    %c0_i32_14 = arith.constant 0 : i32
    %14 = arith.cmpi eq, %arg1, %c0_i32_14 : i32
    %15 = arith.extui %14 : i1 to i32
    %c0_i32_15 = arith.constant 0 : i32
    %16 = arith.cmpi ne, %15, %c0_i32_15 : i32
    scf.if %16 {
      %20 = arith.addf %10, %8 : vector<16x128xf32>
      %21 = math.tanh %20 : vector<16x128xf32>
      %cst_18 = arith.constant dense<0.000000e+00> : vector<32x128xf32>
      %22 = tpu.matmul %6, %21, %cst_18 {dimension_numbers = #tpu.dot_dimension_numbers<[1], [0], [0], [1], [0, 0, 1, 1], [], []>} : vector<32x16xf32>, vector<16x128xf32>, vector<32x128xf32> -> vector<32x128xf32>
      %23 = arith.addf %22, %9 : vector<32x128xf32>
      %c128_i32 = arith.constant 128 : i32
      %24 = arith.muli %arg1, %c128_i32 : i32
      %c0_i32_19 = arith.constant 0 : i32
      %25 = arith.addi %24, %c0_i32_19 : i32
      %26 = tpu.iota {dimensions = array<i32: 1>} : vector<1x128xi32>
      %27 = vector.broadcast %25 : i32 to vector<1x128xi32>
      %28 = arith.addi %27, %26 : vector<1x128xi32>
      %c16_i32 = arith.constant 16 : i32
      %29 = vector.broadcast %c16_i32 : i32 to vector<1x128xi32>
      %30 = arith.cmpi slt, %28, %29 : vector<1x128xi32>
      %cst_20 = arith.constant -1.000000e+30 : f32
      %31 = vector.shape_cast %30 : vector<1x128xi1> to vector<1x128xi1>
      %32 = vector.broadcast %31 : vector<1x128xi1> to vector<32x128xi1>
      %33 = vector.broadcast %cst_20 : f32 to vector<32x128xf32>
      %34 = arith.select %32, %23, %33 : vector<32x128xi1>, vector<32x128xf32>
      %c0_21 = arith.constant 0 : index
      %c0_22 = arith.constant 0 : index
      %35 = vector.load %arg8[%c0_21, %c0_22] : memref<32x128xf32, #tpu.memory_space<vmem>>, vector<32x128xf32>
      %36 = arith.maximumf %35, %34 : vector<32x128xf32>
      %37 = arith.subf %35, %36 : vector<32x128xf32>
      %38 = math.exp %37 : vector<32x128xf32>
      %c0_23 = arith.constant 0 : index
      %c0_24 = arith.constant 0 : index
      %39 = vector.load %arg9[%c0_23, %c0_24] : memref<32x128xf32, #tpu.memory_space<vmem>>, vector<32x128xf32>
      %40 = arith.mulf %38, %39 : vector<32x128xf32>
      %c0_25 = arith.constant 0 : index
      %c0_26 = arith.constant 0 : index
      %41 = vector.load %arg10[%c0_25, %c0_26] : memref<32x128xf32, #tpu.memory_space<vmem>>, vector<32x128xf32>
      %42 = arith.mulf %38, %41 : vector<32x128xf32>
      %c0_27 = arith.constant 0 : index
      %c0_28 = arith.constant 0 : index
      %43 = vector.load %arg11[%c0_27, %c0_28] : memref<32x128xf32, #tpu.memory_space<vmem>>, vector<32x128xf32>
      %44 = arith.mulf %38, %43 : vector<32x128xf32>
      %45 = arith.subf %34, %36 : vector<32x128xf32>
      %46 = math.exp %45 : vector<32x128xf32>
      %47 = arith.mulf %46, %4 : vector<32x128xf32>
      %48 = arith.addf %40, %46 : vector<32x128xf32>
      %49 = arith.addf %42, %47 : vector<32x128xf32>
      %50 = arith.mulf %47, %4 : vector<32x128xf32>
      %51 = arith.addf %44, %50 : vector<32x128xf32>
      %c0_29 = arith.constant 0 : index
      %c0_30 = arith.constant 0 : index
      %52 = vector.load %arg8[%c0_29, %c0_30] : memref<32x128xf32, #tpu.memory_space<vmem>>, vector<32x128xf32>
      tpu.vector_store %arg8[%c0_29, %c0_30], %36 {strides = array<i32>} : memref<32x128xf32, #tpu.memory_space<vmem>>, vector<32x128xf32>,
      %c0_31 = arith.constant 0 : index
      %c0_32 = arith.constant 0 : index
      %53 = vector.load %arg9[%c0_31, %c0_32] : memref<32x128xf32, #tpu.memory_space<vmem>>, vector<32x128xf32>
      tpu.vector_store %arg9[%c0_31, %c0_32], %48 {strides = array<i32>} : memref<32x128xf32, #tpu.memory_space<vmem>>, vector<32x128xf32>,
      %c0_33 = arith.constant 0 : index
      %c0_34 = arith.constant 0 : index
      %54 = vector.load %arg10[%c0_33, %c0_34] : memref<32x128xf32, #tpu.memory_space<vmem>>, vector<32x128xf32>
      tpu.vector_store %arg10[%c0_33, %c0_34], %49 {strides = array<i32>} : memref<32x128xf32, #tpu.memory_space<vmem>>, vector<32x128xf32>,
      %c0_35 = arith.constant 0 : index
      %c0_36 = arith.constant 0 : index
      %55 = vector.load %arg11[%c0_35, %c0_36] : memref<32x128xf32, #tpu.memory_space<vmem>>, vector<32x128xf32>
      tpu.vector_store %arg11[%c0_35, %c0_36], %51 {strides = array<i32>} : memref<32x128xf32, #tpu.memory_space<vmem>>, vector<32x128xf32>,
    } else {
    }
    %c0_i32_16 = arith.constant 0 : i32
    %17 = arith.cmpi eq, %arg1, %c0_i32_16 : i32
    %18 = arith.extui %17 : i1 to i32
    %c0_i32_17 = arith.constant 0 : i32
    %19 = arith.cmpi ne, %18, %c0_i32_17 : i32
    scf.if %19 {
      %c0_18 = arith.constant 0 : index
      %c0_19 = arith.constant 0 : index
      %20 = vector.load %arg8[%c0_18, %c0_19] : memref<32x128xf32, #tpu.memory_space<vmem>>, vector<32x128xf32>
      %cst_20 = arith.constant dense<0xFF800000> : vector<32xf32>
      %21 = vector.multi_reduction <maximumf>, %20, %cst_20 [1] : vector<32x128xf32> to vector<32xf32>
      %22 = vector.shape_cast %21 : vector<32xf32> to vector<32x1xf32>
      %23 = vector.broadcast %22 : vector<32x1xf32> to vector<32x128xf32>
      %24 = arith.subf %20, %23 : vector<32x128xf32>
      %25 = math.exp %24 : vector<32x128xf32>
      %c0_21 = arith.constant 0 : index
      %c0_22 = arith.constant 0 : index
      %26 = vector.load %arg9[%c0_21, %c0_22] : memref<32x128xf32, #tpu.memory_space<vmem>>, vector<32x128xf32>
      %27 = arith.mulf %25, %26 : vector<32x128xf32>
      %cst_23 = arith.constant dense<0.000000e+00> : vector<32xf32>
      %28 = vector.multi_reduction <add>, %27, %cst_23 [1] : vector<32x128xf32> to vector<32xf32>
      %29 = vector.shape_cast %28 : vector<32xf32> to vector<32x1xf32>
      %c0_24 = arith.constant 0 : index
      %c0_25 = arith.constant 0 : index
      %30 = vector.load %arg10[%c0_24, %c0_25] : memref<32x128xf32, #tpu.memory_space<vmem>>, vector<32x128xf32>
      %31 = arith.mulf %25, %30 : vector<32x128xf32>
      %cst_26 = arith.constant dense<0.000000e+00> : vector<32xf32>
      %32 = vector.multi_reduction <add>, %31, %cst_26 [1] : vector<32x128xf32> to vector<32xf32>
      %33 = vector.shape_cast %32 : vector<32xf32> to vector<32x1xf32>
      %c0_27 = arith.constant 0 : index
      %c0_28 = arith.constant 0 : index
      %34 = vector.load %arg11[%c0_27, %c0_28] : memref<32x128xf32, #tpu.memory_space<vmem>>, vector<32x128xf32>
      %35 = arith.mulf %25, %34 : vector<32x128xf32>
      %cst_29 = arith.constant dense<0.000000e+00> : vector<32xf32>
      %36 = vector.multi_reduction <add>, %35, %cst_29 [1] : vector<32x128xf32> to vector<32xf32>
      %37 = vector.shape_cast %36 : vector<32xf32> to vector<32x1xf32>
      %38 = tpu.reciprocal %29 : vector<32x1xf32> -> vector<32x1xf32>
      %39 = arith.mulf %33, %38 : vector<32x1xf32>
      %40 = arith.mulf %37, %38 : vector<32x1xf32>
      %41 = arith.mulf %39, %39 : vector<32x1xf32>
      %42 = arith.subf %40, %41 : vector<32x1xf32>
      %cst_30 = arith.constant 1.000000e-10 : f32
      %43 = vector.broadcast %cst_30 : f32 to vector<32x1xf32>
      %44 = arith.maximumf %42, %43 : vector<32x1xf32>
      %45 = math.sqrt %44 : vector<32x1xf32>
      %46 = tpu.concatenate %39, %45 in 0 : vector<32x1xf32>, vector<32x1xf32> -> vector<64x1xf32>
      %c0_31 = arith.constant 0 : index
      %c0_32 = arith.constant 0 : index
      %c0_33 = arith.constant 0 : index
      %47 = vector.load %arg7[%c0_31, %c0_32, %c0_33] : memref<1x64x1xf32, #tpu.memory_space<vmem>>, vector<1x64x1xf32>
      %48 = vector.shape_cast %47 : vector<1x64x1xf32> to vector<64x1xf32>
      %49 = vector.shape_cast %46 : vector<64x1xf32> to vector<1x64x1xf32>
      tpu.vector_store %arg7[%c0_31, %c0_32, %c0_33], %49 {strides = array<i32>} : memref<1x64x1xf32, #tpu.memory_space<vmem>>, vector<1x64x1xf32>,
    } else {
    }
    return
  }
  func.func @transform_0(%arg0: i32, %arg1: i32) -> (i32, i32, i32) {
    %c0_i32 = arith.constant 0 : i32
    %c0_i32_0 = arith.constant 0 : i32
    return %arg0, %c0_i32, %arg1 : i32, i32, i32
  }
  func.func @transform_1(%arg0: i32, %arg1: i32) -> (i32, i32) {
    %c0_i32 = arith.constant 0 : i32
    %c0_i32_0 = arith.constant 0 : i32
    %c0_i32_1 = arith.constant 0 : i32
    return %c0_i32, %c0_i32_0 : i32, i32
  }
  func.func @transform_2(%arg0: i32, %arg1: i32) -> (i32, i32, i32) {
    %c0_i32 = arith.constant 0 : i32
    %c0_i32_0 = arith.constant 0 : i32
    %c0_i32_1 = arith.constant 0 : i32
    return %arg0, %c0_i32, %c0_i32_0 : i32, i32, i32
  }
  func.func @transform_3(%arg0: i32, %arg1: i32) -> (i32, i32) {
    %c0_i32 = arith.constant 0 : i32
    %c0_i32_0 = arith.constant 0 : i32
    %c0_i32_1 = arith.constant 0 : i32
    return %c0_i32, %c0_i32_0 : i32, i32
  }
  func.func @transform_4(%arg0: i32, %arg1: i32) -> (i32, i32) {
    %c0_i32 = arith.constant 0 : i32
    %c0_i32_0 = arith.constant 0 : i32
    %c0_i32_1 = arith.constant 0 : i32
    return %c0_i32, %c0_i32_0 : i32, i32
  }
  func.func @transform_5(%arg0: i32, %arg1: i32) -> (i32, i32, i32) {
    %c0_i32 = arith.constant 0 : i32
    %c0_i32_0 = arith.constant 0 : i32
    %c0_i32_1 = arith.constant 0 : i32
    return %arg0, %c0_i32, %c0_i32_0 : i32, i32, i32
  }
}

</mosaic_0001>

<bundles_post_ra>
// kernel: tpu_custom_call.1
= control target key start
LH: loop header
LB: loop body
LE: loop exit
PB: predicated region body
PF: predicated region fallthrough
CT: control target
= control target key end

     0   :  { %s2030_s0 = inlined_call_operand.hbm [shape: f32[2,32,128], index: 0, kind: input, shape index: {}]   ;;  %s2031_s1 = inlined_call_operand.hbm [shape: f32[16,32], index: 1, kind: input, shape index: {}]   ;;  %s2032_s2 = inlined_call_operand.hbm [shape: f32[2,16,128], index: 2, kind: input, shape index: {}]   ;;  %s2033_s3 = inlined_call_operand.hbm [shape: f32[32,16], index: 3, kind: input, shape index: {}]   ;;  %s2034_s4 = inlined_call_operand.hbm [shape: f32[32,128], index: 4, kind: input, shape index: {}]   ;;  %s2035_s5 = inlined_call_operand.hbm [shape: f32[2,64,1], index: 5, kind: output, shape index: {}]  }
   0x1   :  { %2055 = sst [smem:[#allocation28_spill]] %s2030_s0 }
   0x2   :  { %2056 = sst [smem:[#allocation29_spill]] %s2031_s1 }
   0x3   :  { %10 = vsyncpa [#allocation7], 0 }
   0x4   :  { %12 = vsyncpa [#allocation7 + $0x1], 0 }
   0x5   :  { %13 = vsyncpa [#allocation10], 0 }
   0x6   :  { %14 = vsyncpa [#allocation14], 0 }
   0x7   :  { %15 = vsyncpa [#allocation8], 0 }
   0x8   :  { %17 = vsyncpa [#allocation8 + $0x1], 0  ;;  %s1656_s18 = smov 0   ;;  %s1658_s19 = smov 0  }
   0x9   :  { %s1660_s20 = smov 0   ;;  %s1662_s21 = smov 0  }
   0xa   :  { %s1664_s22 = smov 0   ;;  %s1666_s23 = smov 0  }
   0xb LB: > { %2057 = sst [smem:[#allocation22_spill]] %s1594_s18  ;;  %s1687_s24 = sadd.s32 4294967295, %s1614_s23   ;;  %s1614_s23 = sphi %s1666_s23, %s23_s23   ;;  %s1610_s22 = sphi %s1664_s22, %s2100_s22   ;;  %s1606_s21 = sphi %s1662_s21, %s2099_s21   ;;  %s1602_s20 = sphi %s1660_s20, %s2095_s20   ;;  %s1598_s19 = sphi %s1658_s19, %s2098_s19   ;;  %s1594_s18 = sphi %s1656_s18, %s2097_s18  }
   0xc   : > { %2058 = sst [smem:[#allocation23_spill]] %s1602_s20  ;;  %s1144_s25 = sadd.s32 4294967294, %s1614_s23  }
   0xd   : > { %2059 = sst [smem:[#allocation24_spill]] %s1614_s23  ;;  %p57_p0 = scmp.ne.s32.totalorder %s1598_s19, %s1594_s18 }
   0xe   : > { %p2036_p1 = scmp.eq.s32.totalorder %s1687_s24, 0  ;;  %p176_p3 = scmp.eq.s32.totalorder %s1144_s25, 1 }
   0xf   : > { %p1145_p5 = scmp.ge.s32.totalorder %s1614_s23, 1  ;;  %p183_p7 = scmp.lt.s32.totalorder %s1614_s23, 3 }
  0x10   : > { %p1696_p4 = por %p2036_p1, %p57_p0  ;;  %p1701_p6 = por %p176_p3, %p57_p0 }
  0x11   : > { %p1706_p8 = pnand %p1145_p5, %p183_p7  ;;  %s1616_s29 = smov [#allocation9]  }
  0x12   : > { %s2060_s26 = scalar_select %p1696_p4, 1, 0 }
  0x13   : > { %s2061_s27 = scalar_select %p1701_p6, 1, 0 }
  0x14   : > { %s2063_s28 = scalar_select %p1706_p8, 1, 0 }
  0x15   : > { %2062 = sst [smem:[#allocation25_spill]] %s2061_s27  ;;  %s195_s30 = sshll.u32 %s1616_s29, 4  ;;  %s196_s30 = int_to_ptr.vmem [resolvable:$true] %s195_s30 }
  0x16   : > { %p1244_p9 = pneg %p1706_p8  ;;  %s35_s7 = sadd.s32 1, %s1610_s22 }
  0x17   : > { %s2065_s1 = sld [smem:[#allocation29_spill]] }
  0x18   : > { %p1715_p11 = pnand %p1244_p9, %p2036_p1 }
  0x1a   : > { %s2064_s6 = scalar_select %p1715_p11, 1, 0 }
  0x1b   : > { %p1728_p13 = pneg %p1715_p11 }
  0x1d   : > { %s1372_s10 = scalar_lea.hbm %s2065_s1, 256 }
  0x1e   : > { %p1373_p12 = scmp.ne.s32.totalorder %s2065_s1, %s1372_s10  ;;  %p1379_p5 = scmp.lt.u32.totalorder %s1372_s10, %s2065_s1 }
  0x20   : > { %p1375_p0 = pnand %p1728_p13, %p1373_p12 }
  0x22   : > { %p1376_p3 = pneg %p1375_p0 }
  0x24   : > { %p1381_p7 = pnand %p1379_p5, %p1376_p3 }
  0x26   : > { %1384 = shalt.err (!%p1381_p7)
}
  0x27   : > { %s1385_s16 = scalar_lea.vmem %s196_s30, 256  ;;  %p1393_p2 = scmp.lt.s32.totalorder %s196_s30, %s196_s30 }
  0x28   : > { %p1386_p9 = scmp.ne.s32.totalorder %s196_s30, %s1385_s16  ;;  %p1394_p6 = scmp.lt.s32.totalorder %s1385_s16, %s1385_s16 }
  0x2a   : > { %p1388_p10 = pnand %p1386_p9, %p1728_p13  ;;  %p1395_p4 = por %p1394_p6, %p1393_p2 }
  0x2c   : > { %p1389_p1 = pneg %p1388_p10 }
  0x2e   : > { %p1396_p8 = pnand %p1395_p4, %p1389_p1 }
  0x30   : > { %1399 = shalt.err (!%p1396_p8)
}
  0x31   : > { %s2039_s17 = smov 128   ;;  %s2041_s25 = smov 8  }
  0x32   : > { %1247 = dma.hbm_to_vmem [thread:$0]  (!%p1715_p11), %s2065_s1, 256, %s196_s30, [#allocation10], %s2039_s17, %s2039_s17, %s2041_s25  }
  0x33   : > { %p37_p1 = scmp.ge.s32.totalorder %s35_s7, 2  ;;  %s44_s9 = sadd.s32 1, %s1602_s20 }
  0x34   : > { %p51_p2 = scmp.ne.s32.totalorder %s1602_s20, %s1598_s19  ;;  %p52_p4 = scmp.eq.s32.totalorder %s1614_s23, 0 }
  0x35   : > { %s2102_s7 = smov (%p37_p1, %s35_s7), 0  ;;  %p2069_p8 = scmp.eq.s32.totalorder %s1687_s24, 1 }
  0x36   : > { %2067 = sst [smem:[#allocation26_spill]] %s2102_s7  ;;  %p1753_p6 = por %p52_p4, %p51_p2 }
  0x37   : > { %p1759_p10 = por %p2069_p8, %p51_p2  ;;  %s39_s12 = ssub.s32 %s1610_s22, %s2102_s7 }
  0x38   : > { %p1268_p12 = scmp.lt.s32.totalorder %s1614_s23, 2  ;;  %p42_p0 = scmp.eq.s32.totalorder %s39_s12, 0 }
  0x39   : > { %s2070_s11 = scalar_select %p1759_p10, 1, 0 }
  0x3a   : > { %s235_s30 = sand.u32 1, %s1614_s23   ;;  %s237_s14 = sand.u32 1, %s1602_s20  }
  0x3b   : > { %s1769_s15 = scalar_select %p42_p0, %s1602_s20, %s44_s9  }
  0x3c   : > { %s1150_s16 = sshll.u32 %s237_s14, 5  ;;  %s1178_s29 = sshll.u32 %s1610_s22, 9 }
  0x3d   : > { %2071 = sst [smem:[#allocation27_spill]] %s1769_s15  ;;  %s2072_s0 = sld [smem:[#allocation28_spill]] }
  0x3e   : > { %s239_s1 = scalar_lea.vmem [#allocation6], %s1150_s16  ;;  %p1779_p3 = pnand %p1268_p12, %p1753_p6 }
  0x3f   : > { %s247_s27 = sshll.u32 %s239_s1, 4  ;;  %s1785_s9 = sshll.u32 %s237_s14, 4  ;;  %s1783_s27 = int_to_ptr.vmem [resolvable:$true] %s247_s27 }
  0x40   : > { %s2073_s12 = scalar_select %p1779_p3, 1, 0 }
  0x41   : > { %s1787_s17 = scalar_lea.sflag [#allocation7], %s235_s30  ;;  %p2052_p7 = pneg %p1779_p3 }
  0x43   : > { %s1775_s25 = scalar_lea.hbm %s2072_s0, %s1178_s29  ;;  %s1405_s16 = scalar_lea.hbm %s2072_s0, 1024 }
  0x44   : > { %s1400_s29 = scalar_lea.hbm %s1775_s25, 512  ;;  %p1406_p2 = scmp.lt.u32.totalorder %s1775_s25, %s2072_s0 }
  0x45   : > { %p1401_p5 = scmp.ne.s32.totalorder %s1775_s25, %s1400_s29  ;;  %p1407_p4 = scmp.lt.u32.totalorder %s1405_s16, %s1400_s29 }
  0x46   : > { %p1409_p8 = scmp.lt.u32.totalorder %s1400_s29, %s1775_s25 }
  0x47   : > { %p1403_p9 = pnand %p2052_p7, %p1401_p5  ;;  %p1408_p6 = por %p1407_p4, %p1406_p2 }
  0x49   : > { %p1404_p1 = pneg %p1403_p9  ;;  %p1410_p12 = por %p1409_p8, %p1408_p6 }
  0x4b   : > { %p1411_p0 = pnand %p1410_p12, %p1404_p1 }
  0x4d   : > { %1414 = shalt.err (!%p1411_p0)
}
  0x4e   : > { %s1415_s30 = scalar_lea.vmem %s1783_s27, 512  ;;  %s1619_s14 = smov [#allocation6]  }
  0x4f   : > { %p1416_p5 = scmp.ne.s32.totalorder %s1783_s27, %s1415_s30  ;;  %s1420_s1 = sshll.u32 %s1619_s14, 4  ;;  %s1421_s1 = int_to_ptr.vmem [resolvable:$false] %s1420_s1 }
  0x50   : > { %s1422_s7 = scalar_lea.vmem %s1421_s1, 1024  ;;  %p1423_p11 = scmp.lt.s32.totalorder %s1783_s27, %s1421_s1 }
  0x51   : > { %p1418_p9 = pnand %p1416_p5, %p2052_p7  ;;  %p1424_p2 = scmp.lt.s32.totalorder %s1422_s7, %s1415_s30 }
  0x53   : > { %p1419_p10 = pneg %p1418_p9  ;;  %p1425_p4 = por %p1424_p2, %p1423_p11 }
  0x55   : > { %p1426_p6 = pnand %p1425_p4, %p1419_p10 }
  0x57   : > { %1429 = shalt.err (!%p1426_p6)
}
  0x58   : > { %s2074_s29 = smov 8   ;;  %s2075_s10 = smov 128  }
  0x59   : > { %1257 = dma.hbm_to_vmem [thread:$0]  (!%p1779_p3), %s1775_s25, 512, %s1783_s27, %s1787_s17, %s2075_s10, %s2075_s10, %s2074_s29  }
  0x5a   : > { %s261_s16 = scalar_lea.vmem [#allocation11], %s1785_s9  ;;  %s1620_s14 = smov [#allocation12]  }
  0x5b   : > { %s1819_s8 = sshll.u32 %s261_s16, 4  ;;  %s208_s1 = sshll.u32 %s1620_s14, 4  ;;  %s209_s1 = int_to_ptr.vmem [resolvable:$true] %s208_s1  ;;  %s1870_s8 = int_to_ptr.vmem [resolvable:$true] %s1819_s8 }
  0x5c   : > { %s1621_s30 = smov [#allocation13]   ;;  %s1430_s20 = scalar_lea.hbm %s2033_s3, 512 }
  0x5d   : > { %s221_s7 = sshll.u32 %s1621_s30, 4  ;;  %p1431_p11 = scmp.ne.s32.totalorder %s2033_s3, %s1430_s20  ;;  %s222_s7 = int_to_ptr.vmem [resolvable:$true] %s221_s7 }
  0x5e   : > { %p1437_p8 = scmp.lt.u32.totalorder %s1430_s20, %s2033_s3 }
  0x5f   : > { %p1433_p10 = pnand %p1431_p11, %p1728_p13 }
  0x61   : > { %p1434_p1 = pneg %p1433_p10 }
  0x63   : > { %p1439_p12 = pnand %p1437_p8, %p1434_p1 }
  0x65   : > { %1442 = shalt.err (!%p1439_p12)
}
  0x66   : > { %s1443_s9 = scalar_lea.vmem %s209_s1, 512  ;;  %p1451_p2 = scmp.lt.s32.totalorder %s209_s1, %s209_s1 }
  0x67   : > { %p1444_p0 = scmp.ne.s32.totalorder %s209_s1, %s1443_s9  ;;  %p1452_p4 = scmp.lt.s32.totalorder %s1443_s9, %s1443_s9 }
  0x69   : > { %p1446_p5 = pnand %p1444_p0, %p1728_p13  ;;  %p1453_p6 = por %p1452_p4, %p1451_p2 }
  0x6b   : > { %p1447_p9 = pneg %p1446_p5 }
  0x6d   : > { %p1454_p7 = pnand %p1453_p6, %p1447_p9 }
  0x6f   : > { %1457 = shalt.err (!%p1454_p7)
}
  0x70   : > { %p2076_p11 = scmp.ne.s32.totalorder %s2064_s6, 0  ;;  %s1179_s20 = sshll.u32 %s1610_s22, 8 }
  0x71   : > { %s1458_s16 = scalar_lea.hbm %s2034_s4, 512 }
  0x72   : > { %1250 = dma.hbm_to_vmem [thread:$0]  (!%p2076_p11), %s2033_s3, 512, %s209_s1, [#allocation10], %s2075_s10, %s2075_s10, %s2074_s29  }
  0x73   : > { %p1459_p7 = scmp.ne.s32.totalorder %s2034_s4, %s1458_s16  ;;  %p1465_p8 = scmp.lt.u32.totalorder %s1458_s16, %s2034_s4 }
  0x75   : > { %p1461_p10 = pnand %p1459_p7, %p1728_p13 }
  0x77   : > { %p1462_p1 = pneg %p1461_p10 }
  0x79   : > { %p1467_p12 = pnand %p1465_p8, %p1462_p1 }
  0x7b   : > { %1470 = shalt.err (!%p1467_p12)
}
  0x7c   : > { %s1471_s1 = scalar_lea.vmem %s222_s7, 512  ;;  %p1479_p2 = scmp.lt.s32.totalorder %s222_s7, %s222_s7 }
  0x7d   : > { %p1472_p0 = scmp.ne.s32.totalorder %s222_s7, %s1471_s1  ;;  %p1480_p4 = scmp.lt.s32.totalorder %s1471_s1, %s1471_s1 }
  0x7f   : > { %p1474_p5 = pnand %p1472_p0, %p1728_p13  ;;  %p1481_p6 = por %p1480_p4, %p1479_p2 }
  0x81   : > { %p1475_p9 = pneg %p1474_p5 }
  0x83   : > { %p1482_p3 = pnand %p1481_p6, %p1475_p9 }
  0x85   : > { %1485 = shalt.err (!%p1482_p3)
}
  0x86   : > { %1253 = dma.hbm_to_vmem [thread:$0]  (!%p2076_p11), %s2034_s4, 512, %s222_s7, [#allocation14], %s2075_s10, %s2075_s10, %s2074_s29  }
  0x87   : > { %s1867_s23 = scalar_lea.hbm %s2032_s2, %s1179_s20  ;;  %p2077_p3 = scmp.ne.s32.totalorder %s2073_s12, 0 }
  0x88   : > { %s1486_s6 = scalar_lea.hbm %s1867_s23, 256  ;;  %s1491_s7 = scalar_lea.hbm %s2032_s2, 512 }
  0x89   : > { %p1487_p13 = scmp.ne.s32.totalorder %s1867_s23, %s1486_s6  ;;  %p2078_p7 = pneg %p2077_p3 }
  0x8a   : > { %p1492_p11 = scmp.lt.u32.totalorder %s1867_s23, %s2032_s2  ;;  %p1493_p8 = scmp.lt.u32.totalorder %s1491_s7, %s1486_s6 }
  0x8b   : > { %p1489_p10 = pnand %p1487_p13, %p2078_p7  ;;  %p1495_p0 = scmp.lt.u32.totalorder %s1486_s6, %s1867_s23 }
  0x8c   : > { %p1494_p12 = por %p1493_p8, %p1492_p11 }
  0x8d   : > { %p1490_p1 = pneg %p1489_p10 }
  0x8e   : > { %p1496_p5 = por %p1495_p0, %p1494_p12 }
  0x90   : > { %p1497_p9 = pnand %p1496_p5, %p1490_p1 }
  0x92   : > { %1500 = shalt.err (!%p1497_p9)
}
  0x93   : > { %s1501_s20 = scalar_lea.vmem %s1870_s8, 256  ;;  %p2079_p4 = pmov %p2078_p7 }
  0x94   : > { %p1502_p2 = scmp.ne.s32.totalorder %s1870_s8, %s1501_s20  ;;  %s1622_s27 = smov [#allocation11]  }
  0x95   : > { %s1506_s25 = sshll.u32 %s1622_s27, 4  ;;  %s1507_s25 = int_to_ptr.vmem [resolvable:$false] %s1506_s25 }
  0x96   : > { %p1504_p6 = pnand %p1502_p2, %p2079_p4  ;;  %s1508_s1 = scalar_lea.vmem %s1507_s25, 512 }
  0x97   : > { %p1509_p7 = scmp.lt.s32.totalorder %s1870_s8, %s1507_s25  ;;  %p1510_p10 = scmp.lt.s32.totalorder %s1508_s1, %s1501_s20 }
  0x98   : > { %p1505_p13 = pneg %p1504_p6 }
  0x99   : > { %p1511_p11 = por %p1510_p10, %p1509_p7 }
  0x9b   : > { %p1512_p8 = pnand %p1511_p11, %p1505_p13 }
  0x9d   : > { %1515 = shalt.err (!%p1512_p8)
}
  0x9e   : > { %1260 = dma.hbm_to_vmem [thread:$0]  (!%p2077_p3), %s1867_s23, 256, %s1870_s8, %s1787_s17, %s2075_s10, %s2075_s10, %s2074_s29  }
  0x9f   : > { %p2080_p1 = scmp.ne.s32.totalorder %s2063_s28, 0 }
  0xa0   : > { %s282_s9 = sand.u32 (!%p2080_p1), 1, %s1687_s24   ;;  %s1903_s0 = sand.u32 (!%p2080_p1), 1, %s1598_s19  }
  0xa1   : > { %280 = sbr.rel (%p2080_p1) target bundleno = 1004 (0x3ec), region = 40  ;;  %s1157_s18 = sshll.u32 (!%p2080_p1), %s1903_s0, 5 }
  0xa2   : > { %s283_s13 = scalar_lea.sflag (!%p2080_p1), [#allocation7], %s282_s9  ;;  %s286_s12 = scalar_lea.vmem (!%p2080_p1), [#allocation6], %s1157_s18 }
  0xa3   : > { %p2081_p12 = scmp.ne.s32.totalorder (!%p2080_p1), %s2060_s26, 0 }
  0xa8   : > { %1569 = dma.done.wait (%p2081_p12), %s283_s13, 512  }
  0xa9   : > { %1571 = vsyncadd (%p2081_p12), %s283_s13, 4294966784  ;;  %p2082_p3 = scmp.eq.s32.totalorder %s1687_s24, 0 }
  0xab   : > { %1573 = dma.done.wait (%p2082_p3), [#allocation10], 256   ;;  %p2083_p0 = pmov %p2082_p3 }
  0xac   : > { %s1159_s28 = sshll.u32 %s1903_s0, 4 }
  0xad   : > { %1575 = vsyncadd (%p2083_p0), [#allocation10], 4294967040  ;;  %s299_s17 = scalar_lea.vmem [#allocation11], %s1159_s28 }
  0xae   : > { %1577 = dma.done.wait (%p2081_p12), %s283_s13, 256  }
  0xaf   : > { %1579 = vsyncadd (%p2081_p12), %s283_s13, 4294967040  ;;  %p2084_p5 = pmov %p2083_p0 }
  0xb0   : > { %p2085_p9 = pmov %p2083_p0 }
  0xb1   : > { %1581 = dma.done.wait (%p2084_p5), [#allocation10], 512  }
  0xb2   : > { %1583 = vsyncadd (%p2085_p9), [#allocation10], 4294966784  ;;  %p2086_p2 = pmov %p2083_p0 }
  0xb3   : > { %p2087_p4 = pmov %p2083_p0 }
  0xb4   : > { %1585 = dma.done.wait (%p2086_p2), [#allocation14], 512  }
  0xb5   : > { %1587 = vsyncadd (%p2087_p4), [#allocation14], 4294966784  ;;  %vm375_vm0 = vcmask 261120   ;;  %v1927_v0 = vld [vmem:[%s286_s12] sm:$0xff]  ;;  %v1929_v1 = vld [vmem:[%s286_s12 + $0x8] sm:$0xff]  ;;  %vm662_vm1 = vcmask 130048   ;;  %v761_v21 = vlaneseq }
  0xb6   : > { %v1931_v2 = vld [vmem:[%s286_s12 + $0x10] sm:$0xff]  ;;  %v1214_v3 = vpack.c.bf16 %v1929_v1, %v1927_v0  ;;  %v1935_v4 = vld [vmem:[%s286_s12 + $0x18] sm:$0xff]  ;;  %v363_v5 = vld [vmem:[#allocation9] sm:$0xff]  ;;  %s1162_s24 = sshll.u32 %s1903_s0, 6  ;;  %vm988_vm3 = vcmask 7168   ;;  %s1180_s29 = sshll.u32 %s1606_s21, 10 }
  0xb7   : > { %v1218_v6 = vpack.c.bf16 %v1935_v4, %v1931_v2  ;;  %1201 = vmatprep.mubr.msk.f32.mxu0 %vm375_vm0, %v363_v5  ;;  %v364_v7 = vld [vmem:[#allocation9 + $0x8] sm:$0xff]  ;;  %v365_v8 = vld [vmem:[#allocation12] sm:$0xff]  ;;  %v366_v18 = vld [vmem:[#allocation12 + $0x8] sm:$0xff]  ;;  %v762_v22 = vand.u32 127, %v761_v21  ;;  %s1956_s26 = scalar_lea.vmem [#allocation15], %s1162_s24  ;;  %s1977_s6 = scalar_lea.hbm %s2035_s5, %s1180_s29 }
  0xb8   : > { %1215 = vmatprep.subr.bf16.mxu0 %v1214_v3  ;;  %1208 = vmatprep.mubr.msk.f32.mxu1 %vm662_vm1, %v365_v8  ;;  %v370_v9 = vld [vmem:[%s299_s17 + $0x8] sm:$0xff]  ;;  %v369_v10 = vld [vmem:[%s299_s17] sm:$0xff]  ;;  %s1011_s10 = sshll.u32 %s1956_s26, 4  ;;  %s998_s21 = scalar_lea.sflag [#allocation8], %s1903_s0  ;;  %s1979_s10 = int_to_ptr.vmem [resolvable:$true] %s1011_s10 }
  0xb9   : > { %1217 = vmatpush3.bf16.msra.mxu0 %v1214_v3  ;;  %v367_v19 = vld [vmem:[#allocation12 + $0x10] sm:$0xff]  ;;  %v368_v20 = vld [vmem:[#allocation12 + $0x18] sm:$0xff]  ;;  %v372_v23 = vld [vmem:[#allocation13 + $0x8] sm:$0xff]  ;;  %vm765_vm2 = vcmp.lt.s32.totalorder %v762_v22, 16  ;;  %s1516_s15 = scalar_lea.vmem %s1979_s10, 1024  ;;  %p2088_p13 = scmp.ne.s32.totalorder %s2070_s11, 0 }
  0xba   : > { %1219 = vmatprep.subr.bf16.mxu0 %v1218_v6  ;;  %v371_v24 = vld [vmem:[#allocation13] sm:$0xff]  ;;  %v374_v29 = vld [vmem:[#allocation13 + $0x18] sm:$0xff]  ;;  %v373_v30 = vld [vmem:[#allocation13 + $0x10] sm:$0xff]  ;;  %p1517_p6 = scmp.ne.s32.totalorder %s1979_s10, %s1516_s15  ;;  %s1623_s16 = smov [#allocation15]  }
  0xbb   : > { %s1520_s7 = sshll.u32 %s1623_s16, 4  ;;  %s1521_s7 = int_to_ptr.vmem [resolvable:$false] %s1520_s7 }
  0xbc   : > { %p1518_p7 = pnand %p1517_p6, %p2088_p13  ;;  %s1522_s14 = scalar_lea.vmem %s1521_s7, 2048 }
  0xbd   : > { %1221 = vmatpush3.bf16.msra.mxu0 %v1218_v6  ;;  %p1523_p11 = scmp.lt.s32.totalorder %s1979_s10, %s1521_s7  ;;  %p1524_p8 = scmp.lt.s32.totalorder %s1522_s14, %s1516_s15 }
  0xbe   : > { %p1519_p10 = pneg %p1518_p7 }
  0xbf   : > { %p1525_p1 = por %p1524_p8, %p1523_p11 }
  0xc0   : > { %1202 = vmatmul.mubr.msk.f32.vlgmr.msra.gmra.mrb[0].mxu0 %vm375_vm0, %v364_v7 }
  0xc1   : > { %p1526_p12 = pnand %p1525_p1, %p1519_p10 }
 0x193   : > { %v1203_v11 = vpop.f32.mrb[0].mxu0 }
 0x194   : > { %v659_v12 = vadd.f32 %v1203_v11, %v370_v9  ;;  %v448_v13 = vpop.f32.mrb[1].mxu0 }
 0x195   : > { %v658_v14 = vadd.f32 %v448_v13, %v369_v10 }
 0x196   : > { %1328 = vtanh.f32 %v659_v12 }
 0x197   : > { %1330 = vtanh.f32 %v658_v14 }
 0x1a0   : > { %v1329_v15 = vpop.eup %1328 }
 0x1a1   : > { %v1331_v16 = vpop.eup %1330 }
 0x1a2   : > { %v1222_v17 = vpack.c.bf16 %v1329_v15, %v1331_v16 }
 0x1a4   : > { %1223 = vmatprep.subr.bf16.mxu1 %v1222_v17 }
 0x1a5   : > { %1225 = vmatpush3.bf16.msra.mxu1 %v1222_v17 }
 0x1a8   : > { %1209 = vmatmul.mubr.msk.f32.vlgmr.msra.gmra.mrb[0].mxu1 %vm662_vm1, %v366_v18 }
 0x1a9   : > { %1211 = vmatprep.mubr.msk.f32.mxu1 %vm662_vm1, %v367_v19 }
 0x1ac   : > { %1212 = vmatmul.mubr.msk.f32.gmra.mrb[2].mxu1 %vm662_vm1, %v368_v20 }
 0x27b   : > { %v1210_v25 = vpop.f32.mrb[0].mxu1 }
 0x27c   : > { %v741_v26 = vpop.f32.mrb[1].mxu1  ;;  %v747_v27 = vadd.f32 %v1210_v25, %v372_v23 }
 0x27d   : > { %v742_v28 = vadd.f32 %v741_v26, %v371_v24 }
 0x27e   : > { %v769_v35 = vsel %vm765_vm2, %v747_v27, -1e+30 }
 0x27f   : > { %v768_v31 = vsel %vm765_vm2, %v742_v28, -1e+30  ;;  %v1213_v32 = vpop.f32.mrb[2].mxu1  ;;  %v777_v39 = vmax.f32 %v769_v35, -1e+30 }
 0x280   : > { %v776_v33 = vmax.f32 %v768_v31, -1e+30  ;;  %v751_v34 = vpop.f32.mrb[3].mxu1  ;;  %v757_v36 = vadd.f32 %v1213_v32, %v374_v29 }
 0x281   : > { %v752_v37 = vadd.f32 %v751_v34, %v373_v30  ;;  %v781_v46 = vsub.f32 -1e+30, %v777_v39  ;;  %v817_v53 = vsub.f32 %v769_v35, %v777_v39 }
 0x282   : > { %868 = vmax.xlane.f32.xlu0 %v776_v33  ;;  %v771_v41 = vsel %vm765_vm2, %v757_v36, -1e+30  ;;  %v780_v43 = vsub.f32 -1e+30, %v776_v33  ;;  %v816_v47 = vsub.f32 %v768_v31, %v776_v33 }
 0x283   : > { %v770_v38 = vsel %vm765_vm2, %v752_v37, -1e+30  ;;  %v779_v42 = vmax.f32 %v771_v41, -1e+30  ;;  %v786_v50 = vmul.f32 1.442695, %v781_v46 }
 0x284   : > { %v778_v40 = vmax.f32 %v770_v38, -1e+30  ;;  %v784_v45 = vmul.f32 1.442695, %v780_v43  ;;  %v820_v51 = vmul.f32 1.442695, %v816_v47 }
 0x285   : > { %v783_v48 = vsub.f32 -1e+30, %v779_v42  ;;  %v819_v57 = vsub.f32 %v771_v41, %v779_v42  ;;  %v822_v60 = vmul.f32 1.442695, %v817_v53 }
 0x286   : > { %872 = vmax.xlane.f32.xlu1 %v778_v40  ;;  %870 = vmax.xlane.f32.xlu0 %v777_v39  ;;  %v782_v44 = vsub.f32 -1e+30, %v778_v40  ;;  %1332 = vpow2.f32 %v784_v45  ;;  %v818_v52 = vsub.f32 %v770_v38, %v778_v40 }
 0x287   : > { %v790_v55 = vmul.f32 1.442695, %v783_v48  ;;  %v826_v6 = vmul.f32 1.442695, %v819_v57 }
 0x288   : > { %v788_v49 = vmul.f32 1.442695, %v782_v44  ;;  %v824_v58 = vmul.f32 1.442695, %v818_v52 }
 0x28a   : > { %874 = vmax.xlane.f32.xlu1 %v779_v42  ;;  %1334 = vpow2.f32 %v788_v49 }
 0x28b   : > { %1336 = vpow2.f32 %v786_v50 }
 0x28c   : > { %1338 = vpow2.f32 %v820_v51 }
 0x28d   : > { %1340 = vpow2.f32 %v790_v55 }
 0x290   : > { %v1333_v5 = vpop.eup %1332 }
 0x291   : > { %v796_v11 = vmul.f32 0.0, %v1333_v5 }
 0x294   : > { %v1335_v12 = vpop.eup %1334 }
 0x295   : > { %v1337_v14 = vpop.eup %1336  ;;  %v798_v18 = vmul.f32 0.0, %v1335_v12 }
 0x296   : > { %v1339_v15 = vpop.eup %1338  ;;  %v797_v20 = vmul.f32 0.0, %v1337_v14 }
 0x297   : > { %v1341_v16 = vpop.eup %1340  ;;  %v832_v17 = vadd.f32 %v1339_v15, %v796_v11  ;;  %v828_v26 = vmul.f32 %v1339_v15, %v1927_v0 }
 0x298   : > { %v799_v25 = vmul.f32 0.0, %v1341_v16 }
 0x299   : > { %v836_v34 = vadd.f32 %v828_v26, %v796_v11  ;;  %v840_v35 = vmul.f32 %v828_v26, %v1927_v0 }
 0x30f   : > { %v869_v54 = vpop.xlane.xlu0 %868 }
 0x310   : > { %v876_v56 = vsub.f32 %v776_v33, %v869_v54 }
 0x312   : > { %v880_v59 = vmul.f32 1.442695, %v876_v56 }
 0x313   : > { %v873_v61 = vpop.xlane.xlu1 %872  ;;  %v871_v62 = vpop.xlane.xlu0 %870 }
 0x314   : > { %1342 = vpow2.f32 %v880_v59  ;;  %v878_v63 = vsub.f32 %v778_v40, %v873_v61  ;;  %v877_v3 = vsub.f32 %v777_v39, %v871_v62  ;;  %v844_v40 = vadd.f32 %v840_v35, %v796_v11 }
 0x315   : > { %1344 = vpow2.f32 %v824_v58 }
 0x316   : > { %v884_v7 = vmul.f32 1.442695, %v878_v63  ;;  %v882_v8 = vmul.f32 1.442695, %v877_v3  ;;  %1346 = vpow2.f32 %v822_v60 }
 0x317   : > { %v875_v9 = vpop.xlane.xlu1 %874 }
 0x318   : > { %1348 = vpow2.f32 %v884_v7  ;;  %v879_v10 = vsub.f32 %v779_v42, %v875_v9 }
 0x319   : > { %1350 = vpow2.f32 %v882_v8 }
 0x31a   : > { %1352 = vpow2.f32 %v826_v6  ;;  %v886_v13 = vmul.f32 1.442695, %v879_v10 }
 0x31c   : > { %1354 = vpow2.f32 %v886_v13 }
 0x31e   : > { %v1343_v19 = vpop.eup %1342 }
 0x31f   : > { %v892_v21 = vmul.f32 %v1343_v19, %v832_v17  ;;  %v1345_v22 = vpop.eup %1344  ;;  %v908_v39 = vmul.f32 %v1343_v19, %v836_v34  ;;  %v924_v44 = vmul.f32 %v1343_v19, %v844_v40 }
 0x320   : > { %v1347_v23 = vpop.eup %1346  ;;  %v834_v24 = vadd.f32 %v1345_v22, %v798_v18  ;;  %v830_v41 = vmul.f32 %v1345_v22, %v1931_v2 }
 0x321   : > { %896 = vadd.xlane.f32.xlu0 %v892_v21  ;;  %v833_v28 = vadd.f32 %v1347_v23, %v797_v20  ;;  %v829_v37 = vmul.f32 %v1347_v23, %v1929_v1 }
 0x322   : > { %v1349_v27 = vpop.eup %1348  ;;  %v838_v46 = vadd.f32 %v830_v41, %v798_v18  ;;  %v842_v0 = vmul.f32 %v830_v41, %v1931_v2 }
 0x323   : > { %v1351_v29 = vpop.eup %1350  ;;  %v894_v30 = vmul.f32 %v1349_v27, %v834_v24  ;;  %v837_v42 = vadd.f32 %v829_v37, %v797_v20  ;;  %v841_v48 = vmul.f32 %v829_v37, %v1929_v1 }
 0x324   : > { %v1353_v31 = vpop.eup %1352  ;;  %v893_v32 = vmul.f32 %v1351_v29, %v833_v28  ;;  %v910_v49 = vmul.f32 %v1349_v27, %v838_v46  ;;  %v846_v51 = vadd.f32 %v842_v0, %v798_v18 }
 0x325   : > { %900 = vadd.xlane.f32.xlu0 %v894_v30  ;;  %v835_v33 = vadd.f32 %v1353_v31, %v799_v25  ;;  %v831_v43 = vmul.f32 %v1353_v31, %v1935_v4  ;;  %v909_v45 = vmul.f32 %v1351_v29, %v837_v42  ;;  %v845_v52 = vadd.f32 %v841_v48, %v797_v20 }
 0x326   : > { %v1355_v36 = vpop.eup %1354  ;;  %898 = vadd.xlane.f32.xlu1 %v893_v32  ;;  %v926_v54 = vmul.f32 %v1349_v27, %v846_v51 }
 0x327   : > { %v895_v38 = vmul.f32 %v1355_v36, %v835_v33  ;;  %v839_v47 = vadd.f32 %v831_v43, %v799_v25  ;;  %v843_v53 = vmul.f32 %v831_v43, %v1935_v4  ;;  %v925_v55 = vmul.f32 %v1351_v29, %v845_v52 }
 0x329   : > { %912 = vadd.xlane.f32.xlu0 %v908_v39  ;;  %v911_v50 = vmul.f32 %v1355_v36, %v839_v47  ;;  %v847_v56 = vadd.f32 %v843_v53, %v799_v25 }
 0x32a   : > { %902 = vadd.xlane.f32.xlu1 %v895_v38 }
 0x32b   : > { %v927_v57 = vmul.f32 %v1355_v36, %v847_v56 }
 0x32d   : > { %928 = vadd.xlane.f32.xlu0 %v924_v44 }
 0x32e   : > { %914 = vadd.xlane.f32.xlu1 %v909_v45 }
 0x331   : > { %916 = vadd.xlane.f32.xlu0 %v910_v49 }
 0x332   : > { %918 = vadd.xlane.f32.xlu1 %v911_v50 }
 0x335   : > { %932 = vadd.xlane.f32.xlu0 %v926_v54 }
 0x336   : > { %930 = vadd.xlane.f32.xlu1 %v925_v55 }
 0x33a   : > { %934 = vadd.xlane.f32.xlu1 %v927_v57 }
 0x3ae   : > { %v897_v2 = vpop.xlane.xlu0 %896 }
 0x3af   : > { %1356 = vrcp.f32 %v897_v2 }
 0x3b2   : > { %v901_v58 = vpop.xlane.xlu0 %900 }
 0x3b3   : > { %v899_v1 = vpop.xlane.xlu1 %898  ;;  %1358 = vrcp.f32 %v901_v58 }
 0x3b4   : > { %1360 = vrcp.f32 %v899_v1 }
 0x3b6   : > { %v913_v59 = vpop.xlane.xlu0 %912 }
 0x3b7   : > { %v903_v60 = vpop.xlane.xlu1 %902 }
 0x3b8   : > { %1362 = vrcp.f32 %v903_v60 }
 0x3b9   : > { %v1357_v61 = vpop.eup %1356 }
 0x3ba   : > { %v940_v4 = vmul.f32 %v1357_v61, %v913_v59  ;;  %v929_v62 = vpop.xlane.xlu0 %928 }
 0x3bb   : > { %v915_v63 = vpop.xlane.xlu1 %914  ;;  %v944_v3 = vmul.f32 %v1357_v61, %v929_v62 }
 0x3bc   : > { %v948_v5 = vmul.f32 %v940_v4, %v940_v4  ;;  %989 = vst.msk [vmem:[%s1956_s26] sm:$0xff] %vm988_vm3, %v940_v4 }
 0x3bd   : > { %v1359_v6 = vpop.eup %1358 }
 0x3be   : > { %v1361_v7 = vpop.eup %1360  ;;  %v952_v8 = vsub.f32 %v944_v3, %v948_v5  ;;  %v917_v9 = vpop.xlane.xlu0 %916 }
 0x3bf   : > { %v941_v10 = vmul.f32 %v1361_v7, %v915_v63  ;;  %v919_v11 = vpop.xlane.xlu1 %918  ;;  %v942_v12 = vmul.f32 %v1359_v6, %v917_v9 }
 0x3c0   : > { %v956_v13 = vmax.f32 %v952_v8, 1e-10 }
 0x3c1   : > { %990 = vst.msk [vmem:[%s1956_s26 + $0x8] sm:$0xff] %vm988_vm3, %v941_v10  ;;  %991 = vst.msk [vmem:[%s1956_s26 + $0x10] sm:$0xff] %vm988_vm3, %v942_v12  ;;  %v950_v17 = vmul.f32 %v942_v12, %v942_v12  ;;  %v949_v20 = vmul.f32 %v941_v10, %v941_v10 }
 0x3c2   : > { %v1363_v14 = vpop.eup %1362  ;;  %1364 = vrsqrt.f32 %v956_v13  ;;  %v933_v15 = vpop.xlane.xlu0 %932  ;;  %vm962_vm4 = vcmp.eq.f32.partialorder %v956_v13, inf  ;;  %v965_v33 = vand.u32 2147483648, %v956_v13  ;;  %vm964_vm5 = vcmp.eq.f32.partialorder %v956_v13, 0.0 }
 0x3c3   : > { %v943_v16 = vmul.f32 %v1363_v14, %v919_v11  ;;  %v931_v18 = vpop.xlane.xlu1 %930  ;;  %v946_v19 = vmul.f32 %v1359_v6, %v933_v15 }
 0x3c4   : > { %v945_v21 = vmul.f32 %v1361_v7, %v931_v18 }
 0x3c5   : > { %992 = vst.msk [vmem:[%s1956_s26 + $0x18] sm:$0xff] %vm988_vm3, %v943_v16  ;;  %v954_v22 = vsub.f32 %v946_v19, %v950_v17  ;;  %v951_v28 = vmul.f32 %v943_v16, %v943_v16 }
 0x3c6   : > { %v953_v23 = vsub.f32 %v945_v21, %v949_v20 }
 0x3c7   : > { %v958_v24 = vmax.f32 %v954_v22, 1e-10  ;;  %v935_v25 = vpop.xlane.xlu1 %934 }
 0x3c8   : > { %v957_v26 = vmax.f32 %v953_v23, 1e-10  ;;  %v947_v27 = vmul.f32 %v1363_v14, %v935_v25 }
 0x3c9   : > { %1366 = vrsqrt.f32 %v958_v24  ;;  %vm976_vm6 = vcmp.eq.f32.partialorder %v958_v24, inf  ;;  %v979_v40 = vand.u32 2147483648, %v958_v24  ;;  %vm978_vm8 = vcmp.eq.f32.partialorder %v958_v24, 0.0 }
 0x3ca   : > { %1368 = vrsqrt.f32 %v957_v26  ;;  %v955_v29 = vsub.f32 %v947_v27, %v951_v28  ;;  %vm969_vm7 = vcmp.eq.f32.partialorder %v957_v26, inf  ;;  %v972_v41 = vand.u32 2147483648, %v957_v26 }
 0x3cb   : > { %vm971_vm9 = vcmp.eq.f32.partialorder %v957_v26, 0.0 }
 0x3cc   : > { %v1365_v30 = vpop.eup %1364  ;;  %v959_v32 = vmax.f32 %v955_v29, 1e-10 }
 0x3cd   : > { %v961_v31 = vmul.f32 %v1365_v30, %v956_v13 }
 0x3ce   : > { %1370 = vrsqrt.f32 %v959_v32  ;;  %vm983_vm10 = vcmp.eq.f32.partialorder %v959_v32, inf  ;;  %v986_v47 = vand.u32 2147483648, %v959_v32  ;;  %vm985_vm11 = vcmp.eq.f32.partialorder %v959_v32, 0.0 }
 0x3cf   : > { %v963_v34 = vsel %vm962_vm4, %v956_v13, %v961_v31 }
 0x3d0   : > { %v966_v35 = vsel %vm964_vm5, %v965_v33, %v963_v34 }
 0x3d1   : > { %993 = vst.msk [vmem:[%s1956_s26 + $0x20] sm:$0xff] %vm988_vm3, %v966_v35 }
 0x3d3   : > { %v1367_v36 = vpop.eup %1366 }
 0x3d4   : > { %v1369_v37 = vpop.eup %1368  ;;  %v975_v38 = vmul.f32 %v1367_v36, %v958_v24 }
 0x3d5   : > { %v968_v39 = vmul.f32 %v1369_v37, %v957_v26 }
 0x3d6   : > { %v977_v42 = vsel %vm976_vm6, %v958_v24, %v975_v38 }
 0x3d7   : > { %v970_v43 = vsel %vm969_vm7, %v957_v26, %v968_v39  ;;  %v980_v44 = vsel %vm978_vm8, %v979_v40, %v977_v42 }
 0x3d8   : > { %v973_v45 = vsel %vm971_vm9, %v972_v41, %v970_v43  ;;  %995 = vst.msk [vmem:[%s1956_s26 + $0x30] sm:$0xff] %vm988_vm3, %v980_v44  ;;  %v1371_v46 = vpop.eup %1370 }
 0x3d9   : > { %994 = vst.msk [vmem:[%s1956_s26 + $0x28] sm:$0xff] %vm988_vm3, %v973_v45  ;;  %v982_v0 = vmul.f32 %v1371_v46, %v959_v32 }
 0x3db   : > { %v984_v48 = vsel %vm983_vm10, %v959_v32, %v982_v0 }
 0x3dc   : > { %v987_v49 = vsel %vm985_vm11, %v986_v47, %v984_v48 }
 0x3dd   : > { %996 = vst.msk [vmem:[%s1956_s26 + $0x38] sm:$0xff] %vm988_vm3, %v987_v49 }
 0x3de   : > { %1529 = shalt.err (!%p1526_p12)
}
 0x3df   : > { %s1530_s30 = scalar_lea.hbm %s1977_s6, 1024  ;;  %s1534_s25 = scalar_lea.hbm %s2035_s5, 2048 }
 0x3e0   : > { %p1531_p3 = scmp.ne.s32.totalorder %s1977_s6, %s1530_s30  ;;  %p1535_p9 = scmp.lt.u32.totalorder %s1977_s6, %s2035_s5 }
 0x3e1   : > { %p1536_p2 = scmp.lt.u32.totalorder %s1534_s25, %s1530_s30  ;;  %p1538_p6 = scmp.lt.u32.totalorder %s1530_s30, %s1977_s6 }
 0x3e2   : > { %p1532_p0 = pnand %p1531_p3, %p2088_p13 }
 0x3e3   : > { %p1537_p4 = por %p1536_p2, %p1535_p9 }
 0x3e4   : > { %p1533_p5 = pneg %p1532_p0 }
 0x3e5   : > { %p1539_p7 = por %p1538_p6, %p1537_p4 }
 0x3e7   : > { %p1540_p10 = pnand %p1539_p7, %p1533_p5 }
 0x3e9   : > { %1543 = shalt.err (!%p1540_p10)
}
 0x3ea   : > { %s1624_s18 = smov 128   ;;  %s1625_s13 = smov 8  }
 0x3eb   : > { %1242 = dma.vmem_to_hbm [thread:$0]  (%p2088_p13), %s1979_s10, 1024, %s1977_s6, %s998_s21, %s1624_s18, %s1624_s18, %s1625_s13  }
 0x3ec PF: > { %s2089_s12 = sld [smem:[#allocation22_spill]]  ;;  %s2090_s28 = sld [smem:[#allocation25_spill]] }
 0x3ed   : > { %s2091_s17 = sld [smem:[#allocation24_spill]] }
 0x3f2   : > { %s1026_s24 = sand.u32 1, %s2089_s12   ;;  %p2092_p11 = scmp.ne.s32.totalorder %s2090_s28, 0 }
 0x3f3   : > { %p2093_p8 = scmp.ge.s32.totalorder %s2091_s17, 2  ;;  %s1027_s26 = scalar_lea.sflag [#allocation8], %s1026_s24 }
 0x3f5   : > { %p1262_p1 = pnand %p2093_p8, %p2092_p11 }
 0x3f7   : > { %1589 = dma.done.wait (!%p1262_p1), %s1027_s26, 1024  }
 0x3f8   : > { %1591 = vsyncadd (!%p1262_p1), %s1027_s26, 4294966272  ;;  %s23_s23 = sadd.s32 1, %s2091_s17   ;;  %s2094_s29 = sld [smem:[#allocation23_spill]] }
 0x3f9   : > { %p20_p12 = scmp.ge.s32.totalorder %s23_s23, 4   ;;  %s2095_s20 = sld [smem:[#allocation27_spill]] }
 0x3fa   : > { %s2096_s11 = sld [smem:[#allocation26_spill]]  ;;  %s2097_s18 = smov %s1598_s19 }
 0x3fb   : > { %s2099_s21 = smov %s1610_s22  ;;  %22 = sbr.rel (!%p20_p12) target bundleno = 11 (0xb), region = 120 }
 0x3fe   : > { %s2098_s19 = smov %s2094_s29 }
 0x400   : > { %s2100_s22 = smov %s2096_s11 }
 0x402   :  { %1032 = vsyncpa [#allocation7], 1 }
 0x403   :  { %1034 = vsyncpa [#allocation7 + $0x1], 1 }
 0x404   :  { %1035 = vsyncpa [#allocation10], 1 }
 0x405   :  { %1036 = vsyncpa [#allocation14], 1 }
 0x406   :  { %1037 = vsyncpa [#allocation8], 1 }
 0x407   :  { %1039 = vsyncpa [#allocation8 + $0x1], 1 }

</bundles_post_ra>
